<compile_context>
chip_gen: v7x
topology: tpu7x:2x2x1
jax: 0.10.0
libtpu: 0.0.40
codegen_flags: <defaults>
</compile_context>

<pallas_src>
import functools

import jax
import jax.numpy as jnp
from jax.experimental import pallas as pl
from jax.experimental.pallas import tpu as pltpu

LEAKY_SLOPE = 0.2   # dense_block GAN convention (nn.LeakyReLU(0.2))
BN_EPS = 1e-5
LANE = 128          # lane-dense pad for hidden dim and output dim
PARAM_ROWS = 8      # gamma / beta / b2 rows, padded to a sublane tile


def _round_up(n, m):
    return ((n + m - 1) // m) * m


def adversary_fc_kernel(x_ref, c_ref, o_ref):
    # Whole problem lives in one VMEM block (shapes are tiny).
    # Consts layout (all 128 lanes wide, f32):
    #   rows [0            : in_dim)        w1^T   (zero-padded lanes >= DIM)
    #   rows [in_dim_pad   : in_dim_pad+128) w2^T  (zero rows >= DIM, zero lanes >= out_dim)
    #   rows [in_dim_pad+128 : +3)           gamma, beta, b2 (zero-padded)
    in_dim = x_ref.shape[1]
    in_dim_pad = c_ref.shape[0] - LANE - PARAM_ROWS
    p_base = in_dim_pad + LANE

    x = x_ref[...]                                              # (B, in_dim) f32

    # Linear 1 (bias omitted: BatchNorm's mean subtraction cancels it exactly).
    w1 = c_ref[0:in_dim, :]                                     # (in_dim, 128)
    h = jnp.dot(x, w1, preferred_element_type=jnp.float32,
                precision=jax.lax.Precision.HIGHEST)            # (B, 128)

    # BatchNorm1d (training mode, biased variance), centered two-pass stats.
    inv_b = 1.0 / h.shape[0]
    mean = jnp.sum(h, axis=0, keepdims=True) * inv_b            # (1, 128)
    hc = h - mean
    var = jnp.sum(hc * hc, axis=0, keepdims=True) * inv_b       # (1, 128)

    gamma = c_ref[p_base + 0:p_base + 1, :]                     # (1, 128), 0 in pad
    beta = c_ref[p_base + 1:p_base + 2, :]                      # (1, 128), 0 in pad
    b2 = c_ref[p_base + 2:p_base + 3, :]                        # (1, 128), 0 in pad

    scale = gamma * jax.lax.rsqrt(var + BN_EPS)                 # rsqrt -> EUP slot
    h = hc * scale + beta                                       # padded lanes -> 0

    # LeakyReLU(0.2): slope < 1  =>  max(h, 0.2*h).
    h = jnp.maximum(h, LEAKY_SLOPE * h)

    # Linear 2 (zero-padded weights/bias -> padded output columns are tanh(0)=0).
    w2 = c_ref[in_dim_pad:in_dim_pad + LANE, :]                 # (128, 128)
    y = jnp.dot(h, w2, preferred_element_type=jnp.float32,
                precision=jax.lax.Precision.HIGHEST) + b2
    o_ref[...] = jnp.tanh(y)                                    # (B, 128)


def prepare_params(w1, b1, gamma, beta, w2, b2):
    """One-time parameter prep: pack everything into ONE pre-padded f32 buffer.

    w1: (DIM, in_dim), w2: (out_dim, DIM) in PyTorch nn.Linear layout.
    b1 is intentionally dropped: BatchNorm removes it exactly.
    Returns (consts, out_dim); consts has shape (in_dim_pad + 128 + 8, 128).
    """
    del b1  # cancelled by the BatchNorm mean subtraction
    w1 = jnp.asarray(w1, jnp.float32)
    w2 = jnp.asarray(w2, jnp.float32)
    dim, in_dim = w1.shape
    out_dim = w2.shape[0]
    assert dim <= LANE and out_dim <= LANE

    in_dim_pad = _round_up(in_dim, 8)
    consts = jnp.zeros((in_dim_pad + LANE + PARAM_ROWS, LANE), jnp.float32)
    consts = consts.at[:in_dim, :dim].set(w1.T)                          # w1^T
    consts = consts.at[in_dim_pad:in_dim_pad + dim, :out_dim].set(w2.T)  # w2^T
    p = in_dim_pad + LANE
    consts = consts.at[p + 0, :dim].set(jnp.asarray(gamma, jnp.float32))
    consts = consts.at[p + 1, :dim].set(jnp.asarray(beta, jnp.float32))
    consts = consts.at[p + 2, :out_dim].set(jnp.asarray(b2, jnp.float32))
    return consts, out_dim


@jax.jit
def adversary_fc_padded(x, consts):
    """x: (B, in_dim) f32, consts from prepare_params.

    Returns the lane-dense padded output (B, 128); columns >= out_dim are exactly
    0.0 (tanh(0)). Slice [:, :out_dim] at the final consumer if needed.
    """
    B, in_dim = x.shape
    assert B > 1, "training-mode BatchNorm1d needs batch > 1 (var would be 0)"
    vmem = pl.BlockSpec(memory_space=pltpu.MemorySpace.VMEM)
    cost = pl.CostEstimate(
        flops=2 * B * (in_dim * LANE + LANE * LANE),
        transcendentals=B * LANE + LANE,                 # tanh + rsqrt
        bytes_accessed=(x.size + consts.size + B * LANE) * 4,
    )
    return pl.pallas_call(
        adversary_fc_kernel,
        out_shape=jax.ShapeDtypeStruct((B, LANE), jnp.float32),
        in_specs=[vmem, vmem],
        out_specs=vmem,
        cost_estimate=cost,
    )(x, consts)


if __name__ == "__main__":
    # Small shapes consistent with the module: in_dim=32, DIM=8, out_dim=4, batch=8.
    B, IN_DIM, DIM, OUT_DIM = 8, 32, 8, 4

    key = jax.random.PRNGKey(0)
    kx, kw1, kb1, kw2, kb2 = jax.random.split(key, 5)

    x = jax.random.normal(kx, (B, IN_DIM), dtype=jnp.float32)

    # Deterministic PyTorch-style init: U(-1/sqrt(fan_in), 1/sqrt(fan_in)).
    lim1 = 1.0 / (IN_DIM ** 0.5)
    w1 = jax.random.uniform(kw1, (DIM, IN_DIM), jnp.float32, -lim1, lim1)
    b1 = jax.random.uniform(kb1, (DIM,), jnp.float32, -lim1, lim1)
    lim2 = 1.0 / (DIM ** 0.5)
    w2 = jax.random.uniform(kw2, (OUT_DIM, DIM), jnp.float32, -lim2, lim2)
    b2 = jax.random.uniform(kb2, (OUT_DIM,), jnp.float32, -lim2, lim2)
    gamma = jnp.ones((DIM,), jnp.float32)   # BatchNorm1d default affine init
    beta = jnp.zeros((DIM,), jnp.float32)

    consts, out_dim = prepare_params(w1, b1, gamma, beta, w2, b2)
    out_pad = adversary_fc_padded(x, consts)          # (B, 128), hot path (no slice)
    jax.block_until_ready(out_pad)
    out = out_pad[:, :out_dim]                        # consumer-side slice, once

    # Pure-JAX reference check, faithful to the PyTorch module (including b1;
    # the kernel omits it because BN's mean subtraction cancels it exactly).
    h_ref = x @ w1.T + b1
    m = h_ref.mean(0, keepdims=True)
    v = ((h_ref - m) ** 2).mean(0, keepdims=True)
    h_ref = (h_ref - m) / jnp.sqrt(v + BN_EPS) * gamma + beta
    h_ref = jnp.where(h_ref >= 0, h_ref, LEAKY_SLOPE * h_ref)
    y_ref = jnp.tanh(h_ref @ w2.T + b2)

    assert out.shape == (B, OUT_DIM)
    assert jnp.allclose(out, y_ref, atol=2e-5, rtol=2e-5)
    # Padded output columns must be exactly tanh(0) = 0 (zero-pad invariant).
    assert jnp.all(out_pad[:, out_dim:] == 0.0)

    print("KERNEL_OK")
</pallas_src>

<mosaic_0001>
module attributes {stable_mosaic.version = 11 : i64} {
  func.func @adversary_fc_kernel(%arg0: memref<8x32xf32, #tpu.memory_space<vmem>>, %arg1: memref<168x128xf32, #tpu.memory_space<vmem>>, %arg2: memref<8x128xf32, #tpu.memory_space<vmem>>) attributes {dimension_semantics = [], scalar_prefetch = 0 : i64, scratch_operands = 0 : i64, tpu.core_type = #tpu.core_type<tc>} {
    %c0 = arith.constant 0 : index
    %c0_0 = arith.constant 0 : index
    %0 = vector.load %arg0[%c0, %c0_0] : memref<8x32xf32, #tpu.memory_space<vmem>>, vector<8x32xf32>
    %c0_1 = arith.constant 0 : index
    %c0_2 = arith.constant 0 : index
    %1 = vector.load %arg1[%c0_1, %c0_2] : memref<168x128xf32, #tpu.memory_space<vmem>>, vector<32x128xf32>
    %cst = arith.constant dense<0.000000e+00> : vector<8x128xf32>
    %2 = tpu.matmul %0, %1, %cst {dimension_numbers = #tpu.dot_dimension_numbers<[1], [0], [0], [1], [0, 0, 1, 1], [], []>, precision = #tpu.contract_precision<fp32>} : vector<8x32xf32>, vector<32x128xf32>, vector<8x128xf32> -> vector<8x128xf32>
    %cst_3 = arith.constant dense<0.000000e+00> : vector<128xf32>
    %3 = vector.multi_reduction <add>, %2, %cst_3 [0] : vector<8x128xf32> to vector<128xf32>
    %4 = vector.shape_cast %3 : vector<128xf32> to vector<1x128xf32>
    %cst_4 = arith.constant 1.250000e-01 : f32
    %5 = vector.broadcast %cst_4 : f32 to vector<1x128xf32>
    %6 = arith.mulf %4, %5 : vector<1x128xf32>
    %7 = vector.broadcast %6 : vector<1x128xf32> to vector<8x128xf32>
    %8 = arith.subf %2, %7 : vector<8x128xf32>
    %9 = arith.mulf %8, %8 : vector<8x128xf32>
    %cst_5 = arith.constant dense<0.000000e+00> : vector<128xf32>
    %10 = vector.multi_reduction <add>, %9, %cst_5 [0] : vector<8x128xf32> to vector<128xf32>
    %11 = vector.shape_cast %10 : vector<128xf32> to vector<1x128xf32>
    %cst_6 = arith.constant 1.250000e-01 : f32
    %12 = vector.broadcast %cst_6 : f32 to vector<1x128xf32>
    %13 = arith.mulf %11, %12 : vector<1x128xf32>
    %c160 = arith.constant 160 : index
    %c0_7 = arith.constant 0 : index
    %14 = vector.load %arg1[%c160, %c0_7] : memref<168x128xf32, #tpu.memory_space<vmem>>, vector<1x128xf32>
    %c161 = arith.constant 161 : index
    %c0_8 = arith.constant 0 : index
    %15 = vector.load %arg1[%c161, %c0_8] : memref<168x128xf32, #tpu.memory_space<vmem>>, vector<1x128xf32>
    %c162 = arith.constant 162 : index
    %c0_9 = arith.constant 0 : index
    %16 = vector.load %arg1[%c162, %c0_9] : memref<168x128xf32, #tpu.memory_space<vmem>>, vector<1x128xf32>
    %cst_10 = arith.constant 9.99999974E-6 : f32
    %17 = vector.broadcast %cst_10 : f32 to vector<1x128xf32>
    %18 = arith.addf %13, %17 : vector<1x128xf32>
    %19 = math.rsqrt %18 : vector<1x128xf32>
    %20 = arith.mulf %14, %19 : vector<1x128xf32>
    %21 = vector.broadcast %20 : vector<1x128xf32> to vector<8x128xf32>
    %22 = arith.mulf %8, %21 : vector<8x128xf32>
    %23 = vector.broadcast %15 : vector<1x128xf32> to vector<8x128xf32>
    %24 = arith.addf %22, %23 : vector<8x128xf32>
    %cst_11 = arith.constant 2.000000e-01 : f32
    %25 = vector.broadcast %cst_11 : f32 to vector<8x128xf32>
    %26 = arith.mulf %25, %24 : vector<8x128xf32>
    %27 = arith.maximumf %24, %26 : vector<8x128xf32>
    %c32 = arith.constant 32 : index
    %c0_12 = arith.constant 0 : index
    %28 = vector.load %arg1[%c32, %c0_12] : memref<168x128xf32, #tpu.memory_space<vmem>>, vector<128x128xf32>
    %cst_13 = arith.constant dense<0.000000e+00> : vector<8x128xf32>
    %29 = tpu.matmul %27, %28, %cst_13 {dimension_numbers = #tpu.dot_dimension_numbers<[1], [0], [0], [1], [0, 0, 1, 1], [], []>, precision = #tpu.contract_precision<fp32>} : vector<8x128xf32>, vector<128x128xf32>, vector<8x128xf32> -> vector<8x128xf32>
    %30 = vector.broadcast %16 : vector<1x128xf32> to vector<8x128xf32>
    %31 = arith.addf %29, %30 : vector<8x128xf32>
    %32 = math.tanh %31 : vector<8x128xf32>
    %c0_14 = arith.constant 0 : index
    %c0_15 = arith.constant 0 : index
    %33 = vector.load %arg2[%c0_14, %c0_15] : memref<8x128xf32, #tpu.memory_space<vmem>>, vector<8x128xf32>
    tpu.vector_store %arg2[%c0_14, %c0_15], %32 {strides = array<i32>} : memref<8x128xf32, #tpu.memory_space<vmem>>, vector<8x128xf32>,
    return
  }
}

</mosaic_0001>

<bundles_post_ra>
// kernel: adversary_fc_padded.1
= control target key start
LH: loop header
LB: loop body
LE: loop exit
PB: predicated region body
PF: predicated region fallthrough
CT: control target
= control target key end

     0   :  { %7 = vsyncpa [#allocation3], 0  ;;  %s2263_s0 = inlined_call_operand.hbm [shape: f32[8,32], index: 0, kind: input, shape index: {}]   ;;  %s2264_s1 = inlined_call_operand.hbm [shape: f32[168,128], index: 1, kind: input, shape index: {}]   ;;  %s2265_s2 = inlined_call_operand.hbm [shape: f32[8,128], index: 2, kind: output, shape index: {}]  }
   0x1   :  { %8 = vsyncpa [#allocation6], 0 }
   0x2   :  { %9 = vsyncpa [#allocation4], 0  ;;  %s1939_s9 = smov [#allocation2]   ;;  %s1940_s11 = smov [#allocation5]  }
   0x3   :  { %s16_s10 = sshll.u32 %s1939_s9, 4  ;;  %s25_s12 = sshll.u32 %s1940_s11, 4  ;;  %s17_s10 = int_to_ptr.vmem [resolvable:$true] %s16_s10  ;;  %s1962_s12 = int_to_ptr.vmem [resolvable:$true] %s25_s12 }
   0x4   :  { %s1867_s15 = scalar_lea.hbm %s2263_s0, 128 }
   0x5   :  { %p1868_p0 = scmp.ne.s32.totalorder %s2263_s0, %s1867_s15  ;;  %p1871_p1 = scmp.lt.u32.totalorder %s1867_s15, %s2263_s0 }
   0x7   :  { %p1873_p2 = pnand %p1871_p1, %p1868_p0 }
   0x9   :  { %1876 = shalt.err (!%p1873_p2)
}
   0xa   :  { %s1877_s20 = scalar_lea.vmem %s17_s10, 128  ;;  %p1882_p4 = scmp.lt.s32.totalorder %s17_s10, %s17_s10 }
   0xb   :  { %p1878_p3 = scmp.ne.s32.totalorder %s17_s10, %s1877_s20  ;;  %p1883_p5 = scmp.lt.s32.totalorder %s1877_s20, %s1877_s20 }
   0xd   :  { %p1884_p6 = por %p1883_p5, %p1882_p4 }
   0xf   :  { %p1885_p7 = pnand %p1884_p6, %p1878_p3 }
  0x11   :  { %1888 = shalt.err (!%p1885_p7)
}
  0x12   :  { %19 = dma.hbm_to_vmem [thread:$0]  %s2263_s0, 128, %s17_s10, [#allocation3]  }
  0x13   :  { %s1889_s25 = scalar_lea.hbm %s2264_s1, 2688 }
  0x14   :  { %p1890_p8 = scmp.ne.s32.totalorder %s2264_s1, %s1889_s25  ;;  %p1893_p9 = scmp.lt.u32.totalorder %s1889_s25, %s2264_s1 }
  0x16   :  { %p1895_p10 = pnand %p1893_p9, %p1890_p8 }
  0x18   :  { %1898 = shalt.err (!%p1895_p10)
}
  0x19   :  { %s1899_s30 = scalar_lea.vmem %s1962_s12, 2688  ;;  %p1904_p12 = scmp.lt.s32.totalorder %s1962_s12, %s1962_s12 }
  0x1a   :  { %p1900_p11 = scmp.ne.s32.totalorder %s1962_s12, %s1899_s30  ;;  %p1905_p13 = scmp.lt.s32.totalorder %s1899_s30, %s1899_s30 }
  0x1c   :  { %p1906_p0 = por %p1905_p13, %p1904_p12 }
  0x1e   :  { %p1907_p1 = pnand %p1906_p0, %p1900_p11 }
  0x20   :  { %1910 = shalt.err (!%p1907_p1)
}
  0x21   :  { %s1941_s0 = smov 128   ;;  %s1942_s3 = smov 8  }
  0x22   :  { %31 = dma.hbm_to_vmem [thread:$0]  %s2264_s1, 2688, %s1962_s12, [#allocation6], %s1941_s0, %s1941_s0, %s1942_s3  }
  0x23   :  { %1933 = dma.done.wait [#allocation3], 128  }
  0x24   :  { %1934 = vsyncadd [#allocation3], 4294967168 }
  0x25   :  { %1935 = dma.done.wait [#allocation6], 2688  }
  0x26   :  { %1936 = vsyncadd [#allocation6], 4294964608  ;;  %v1943_v0 = vmov 0.0|0.0   ;;  %vm1944_vm0 = vmmov 0   ;;  %v1945_v1 = vmov 0.0   ;;  %vm43_vm1 = vcmask 261120  }
  0x27   :  { %1655 = vmatprep.subr.bf16.mxu0 %v1943_v0  ;;  %1387 = vmatprep.mubr.msk.f32.mxu0 %vm1944_vm0, %v1945_v1  ;;  %v39_v2 = vld [vmem:[#allocation5] sm:$0xff]  ;;  %v40_v3 = vld [vmem:[#allocation5 + $0x8] sm:$0xff]  ;;  %v41_v4 = vld [vmem:[#allocation5 + $0x10] sm:$0xff]  ;;  %s1946_s1 = smov [#allocation7]  }
  0x28   :  { %1739 = vmatprep.subr.bf16.mxu1 %v1943_v0  ;;  %1547 = vmatprep.mubr.msk.f32.mxu1 %vm1944_vm0, %v1945_v1  ;;  %v48_v5 = vand.u32 4294901760, %v39_v2  ;;  %v51_v6 = vand.u32 4294901760, %v40_v3  ;;  %v42_v7 = vld [vmem:[#allocation5 + $0x18] sm:$0xff]  ;;  %v54_v8 = vand.u32 4294901760, %v41_v4  ;;  %v566_v41 = vld [vmem:[#allocation5 + $0x20] sm:$0xff]  ;;  %v567_v42 = vld [vmem:[#allocation5 + $0x28] sm:$0xff] }
  0x29   :  { %v38_v9 = vld [vmem:[#allocation2] sm:$0xff]  ;;  %v57_v10 = vand.u32 4294901760, %v42_v7  ;;  %v587_v43 = vand.u32 4294901760, %v566_v41  ;;  %v590_v44 = vand.u32 4294901760, %v567_v42  ;;  %v568_v47 = vld [vmem:[#allocation5 + $0x30] sm:$0xff]  ;;  %v570_v54 = vld [vmem:[#allocation5 + $0x40] sm:$0xff] }
  0x2a   :  { %v45_v11 = vsel %vm43_vm1, %v38_v9, 0  ;;  %v1656_v12 = vpack.c.bf16 %v51_v6, %v48_v5  ;;  %v128_v13 = vsub.f32 %v39_v2, %v48_v5  ;;  %v135_v14 = vsub.f32 %v40_v3, %v51_v6  ;;  %v569_v48 = vld [vmem:[#allocation5 + $0x38] sm:$0xff]  ;;  %v571_v56 = vld [vmem:[#allocation5 + $0x48] sm:$0xff]  ;;  %v572_v62 = vld [vmem:[#allocation5 + $0x50] sm:$0xff]  ;;  %s1235_s6 = sshll.u32 %s1946_s1, 4  ;;  %s1236_s6 = int_to_ptr.vmem [resolvable:$true] %s1235_s6 }
  0x2b   :  { %v142_v15 = vsub.f32 %v41_v4, %v54_v8  ;;  %v149_v16 = vsub.f32 %v42_v7, %v57_v10  ;;  %v116_v17 = vand.u32 4294901760, %v45_v11  ;;  %v1659_v18 = vpack.c.bf16 %v57_v10, %v54_v8  ;;  %v573_v63 = vld [vmem:[#allocation5 + $0x58] sm:$0xff]  ;;  %v574_v8 = vld [vmem:[#allocation5 + $0x60] sm:$0xff]  ;;  %v575_v9 = vld [vmem:[#allocation5 + $0x68] sm:$0xff]  ;;  %s1911_s7 = scalar_lea.vmem %s1236_s6, 128  ;;  %p1916_p3 = scmp.lt.s32.totalorder %s1236_s6, %s1236_s6 }
  0x2c   :  { %1657 = vmatpush3.bf16.msra.mxu0 %v1656_v12  ;;  %v129_v19 = vand.u32 4294901760, %v128_v13  ;;  %v136_v20 = vand.u32 4294901760, %v135_v14  ;;  %v1668_v37 = vpack.c.bf16 %v135_v14, %v128_v13  ;;  %v2023_v45 = vsub.f32 %v566_v41, %v587_v43  ;;  %p1912_p2 = scmp.ne.s32.totalorder %s1236_s6, %s1911_s7  ;;  %p1917_p4 = scmp.lt.s32.totalorder %s1911_s7, %s1911_s7 }
  0x2d   :  { %v143_v21 = vand.u32 4294901760, %v142_v15  ;;  %1658 = vmatprep.subr.bf16.mxu0 %v1943_v0  ;;  %v117_v22 = vsub.f32 %v45_v11, %v116_v17  ;;  %v150_v23 = vand.u32 4294901760, %v149_v16  ;;  %v1671_v38 = vpack.c.bf16 %v149_v16, %v142_v15 }
  0x2e   :  { %v130_v24 = vsub.f32 %v128_v13, %v129_v19  ;;  %v137_v25 = vsub.f32 %v135_v14, %v136_v20  ;;  %v1680_v39 = vpack.c.bf16 %v136_v20, %v129_v19  ;;  %v2025_v46 = vsub.f32 %v567_v42, %v590_v44  ;;  %p1918_p5 = por %p1917_p4, %p1916_p3 }
  0x2f   :  { %v144_v26 = vsub.f32 %v142_v15, %v143_v21  ;;  %v118_v27 = vand.u32 4294901760, %v117_v22  ;;  %v151_v28 = vsub.f32 %v149_v16, %v150_v23  ;;  %v1683_v40 = vpack.c.bf16 %v150_v23, %v143_v21  ;;  %v576_v16 = vld [vmem:[#allocation5 + $0x70] sm:$0xff] }
  0x30   :  { %1660 = vmatpush3.bf16.msra.mxu0 %v1659_v18  ;;  %v131_v29 = vand.u32 4294901760, %v130_v24  ;;  %v138_v30 = vand.u32 4294901760, %v137_v25  ;;  %v1740_v49 = vpack.c.bf16 %v2025_v46, %v2023_v45  ;;  %v593_v50 = vand.u32 4294901760, %v568_v47  ;;  %v578_v24 = vld [vmem:[#allocation5 + $0x80] sm:$0xff]  ;;  %v579_v25 = vld [vmem:[#allocation5 + $0x88] sm:$0xff]  ;;  %p1919_p6 = pnand %p1918_p5, %p1912_p2 }
  0x31   :  { %v119_v31 = vsub.f32 %v117_v22, %v118_v27  ;;  %1661 = vmatprep.subr.bf16.mxu0 %v1943_v0  ;;  %v145_v33 = vand.u32 4294901760, %v144_v26  ;;  %v152_v34 = vand.u32 4294901760, %v151_v28  ;;  %v596_v51 = vand.u32 4294901760, %v569_v48 }
  0x32   :  { %v1662_v32 = vpack.c.bf16 %v138_v30, %v131_v29  ;;  %1741 = vmatpush3.bf16.msra.mxu1 %v1740_v49  ;;  %v2029_v52 = vsub.f32 %v568_v47, %v593_v50  ;;  %v599_v57 = vand.u32 4294901760, %v570_v54  ;;  %v602_v58 = vand.u32 4294901760, %v571_v56 }
  0x33   :  { %v120_v35 = vand.u32 4294901760, %v119_v31  ;;  %v1665_v36 = vpack.c.bf16 %v152_v34, %v145_v33  ;;  %v2031_v53 = vsub.f32 %v569_v48, %v596_v51  ;;  %1742 = vmatprep.subr.bf16.mxu1 %v1943_v0  ;;  %v2036_v59 = vpack.c.bf16 %v590_v44, %v587_v43  ;;  %v581_v33 = vld [vmem:[#allocation5 + $0x98] sm:$0xff] }
  0x34   :  { %v2038_v60 = vsub.f32 %v570_v54, %v599_v57  ;;  %v2041_v61 = vsub.f32 %v571_v56, %v602_v58  ;;  %v605_v2 = vand.u32 4294901760, %v572_v62  ;;  %v608_v3 = vand.u32 4294901760, %v573_v63 }
  0x35   :  { %1388 = vmatmul.mubr.f32.vlgmr.msra.gmra.mrb[0].mxu0 %v120_v35  ;;  %v1743_v55 = vpack.c.bf16 %v2031_v53, %v2029_v52  ;;  %v2047_v5 = vpack.c.bf16 %v596_v51, %v593_v50  ;;  %v611_v11 = vand.u32 4294901760, %v574_v8  ;;  %v2058_v13 = vpack.c.bf16 %v602_v58, %v599_v57 }
  0x36   :  { %1663 = vmatpush3.bf16.msra.mxu0 %v1662_v32  ;;  %1398 = vmatprep.mubr.msk.f32.mxu0 %vm1944_vm0, %v1945_v1  ;;  %v1746_v4 = vpack.c.bf16 %v2041_v61, %v2038_v60  ;;  %v2049_v6 = vsub.f32 %v572_v62, %v605_v2  ;;  %v2051_v7 = vsub.f32 %v573_v63, %v608_v3  ;;  %v617_v19 = vand.u32 4294901760, %v576_v16  ;;  %v580_v32 = vld [vmem:[#allocation5 + $0x90] sm:$0xff] }
  0x37   :  { %1664 = vmatprep.subr.bf16.mxu0 %v1943_v0  ;;  %1744 = vmatpush3.bf16.msra.mxu1 %v1743_v55  ;;  %v2060_v14 = vsub.f32 %v574_v8, %v611_v11  ;;  %v2069_v21 = vpack.c.bf16 %v608_v3, %v605_v2  ;;  %v626_v28 = vand.u32 4294901760, %v579_v25  ;;  %v680_v42 = vand.u32 4294901760, %v2023_v45 }
  0x38   :  { %1745 = vmatprep.subr.bf16.mxu1 %v1943_v0  ;;  %v1749_v10 = vpack.c.bf16 %v2051_v7, %v2049_v6  ;;  %v687_v43 = vand.u32 4294901760, %v2025_v46  ;;  %v694_v51 = vand.u32 4294901760, %v2029_v52  ;;  %v701_v54 = vand.u32 4294901760, %v2031_v53 }
  0x39   :  { %v2084_v31 = vsub.f32 %v579_v25, %v626_v28  ;;  %v681_v47 = vsub.f32 %v2023_v45, %v680_v42  ;;  %v715_v62 = vand.u32 4294901760, %v2041_v61 }
  0x3a   :  { %1666 = vmatpush3.bf16.msra.mxu0 %v1665_v36  ;;  %v629_v36 = vand.u32 4294901760, %v580_v32  ;;  %v688_v48 = vsub.f32 %v2025_v46, %v687_v43  ;;  %v695_v56 = vsub.f32 %v2029_v52, %v694_v51  ;;  %v702_v57 = vsub.f32 %v2031_v53, %v701_v54 }
  0x3b   :  { %1667 = vmatprep.subr.bf16.mxu0 %v1943_v0  ;;  %1747 = vmatpush3.bf16.msra.mxu1 %v1746_v4  ;;  %v682_v49 = vand.u32 4294901760, %v681_v47  ;;  %v708_v46 = vand.u32 4294901760, %v2038_v60  ;;  %v716_v3 = vsub.f32 %v2041_v61, %v715_v62  ;;  %v729_v52 = vand.u32 4294901760, %v2051_v7 }
  0x3c   :  { %1748 = vmatprep.subr.bf16.mxu1 %v1943_v0  ;;  %v689_v50 = vand.u32 4294901760, %v688_v48  ;;  %v696_v58 = vand.u32 4294901760, %v695_v56  ;;  %v703_v45 = vand.u32 4294901760, %v702_v57 }
  0x3d   :  { %1399 = vmatmul.mubr.f32.vlgmr.msra.gmra.mrb[0].mxu0 %v116_v17  ;;  %v709_v2 = vsub.f32 %v2038_v60, %v708_v46  ;;  %v717_v8 = vand.u32 4294901760, %v716_v3 }
  0x3e   :  { %1669 = vmatpush3.bf16.msra.mxu0 %v1668_v37  ;;  %1409 = vmatprep.mubr.msk.f32.mxu0 %vm1944_vm0, %v1945_v1  ;;  %v632_v37 = vand.u32 4294901760, %v581_v33  ;;  %v2117_v55 = vpack.c.bf16 %v689_v50, %v682_v49  ;;  %v2123_v63 = vpack.c.bf16 %v703_v45, %v696_v58  ;;  %v2157_v50 = vpack.c.bf16 %v687_v43, %v680_v42 }
  0x3f   :  { %1670 = vmatprep.subr.bf16.mxu0 %v1943_v0  ;;  %1750 = vmatpush3.bf16.msra.mxu1 %v1749_v10  ;;  %v710_v4 = vand.u32 4294901760, %v709_v2 }
  0x40   :  { %1751 = vmatprep.subr.bf16.mxu1 %v1943_v0  ;;  %v2109_v44 = vpack.c.bf16 %v632_v37, %v629_v36 }
  0x41   :  { %v2129_v10 = vpack.c.bf16 %v717_v8, %v710_v4 }
  0x42   :  { %1672 = vmatpush3.bf16.msra.mxu0 %v1671_v38  ;;  %v2093_v38 = vsub.f32 %v580_v32, %v629_v36 }
  0x43   :  { %1673 = vmatprep.subr.bf16.mxu0 %v1943_v0 }
  0x44   :  { %v778_v47 = vand.u32 4294901760, %v2093_v38 }
  0x45   :  { %1410 = vmatmul.mubr.f32.vlgmr.msra.gmra.mrb[0].mxu0 %v117_v22  ;;  %v2071_v22 = vsub.f32 %v576_v16, %v617_v19 }
  0x46   :  { %1675 = vmatpush3.bf16.msra.mxu0 %v1656_v12  ;;  %1420 = vmatprep.mubr.msk.f32.mxu0 %vm1944_vm0, %v1945_v1 }
  0x47   :  { %1676 = vmatprep.subr.bf16.mxu0 %v1943_v0  ;;  %v750_v25 = vand.u32 4294901760, %v2071_v22 }
  0x4a   :  { %1678 = vmatpush3.bf16.msra.mxu0 %v1659_v18 }
  0x4b   :  { %1679 = vmatprep.subr.bf16.mxu0 %v1943_v0 }
  0x4d   :  { %1421 = vmatmul.mubr.f32.vlgmr.msra.gmra.mrb[0].mxu0 %v118_v27  ;;  %v623_v27 = vand.u32 4294901760, %v578_v24 }
  0x4e   :  { %1681 = vmatpush3.bf16.msra.mxu0 %v1680_v39  ;;  %1431 = vmatprep.mubr.msk.f32.mxu0 %vm1944_vm0, %v1945_v1  ;;  %v2095_v39 = vsub.f32 %v581_v33, %v632_v37 }
  0x4f   :  { %1682 = vmatprep.subr.bf16.mxu0 %v1943_v0  ;;  %v2082_v30 = vsub.f32 %v578_v24, %v623_v27 }
  0x50   :  { %v1761_v41 = vpack.c.bf16 %v2095_v39, %v2093_v38 }
  0x51   :  { %v1758_v34 = vpack.c.bf16 %v2084_v31, %v2082_v30  ;;  %v764_v33 = vand.u32 4294901760, %v2082_v30 }
  0x52   :  { %1684 = vmatpush3.bf16.msra.mxu0 %v1683_v40  ;;  %v2099_v40 = vpack.c.bf16 %v626_v28, %v623_v27 }
  0x53   :  { %1685 = vmatprep.subr.bf16.mxu0 %v1943_v0 }
  0x55   :  { %1432 = vmatmul.mubr.f32.vlgmr.msra.gmra.mrb[0].mxu0 %v116_v17 }
  0x56   :  { %1687 = vmatpush3.bf16.msra.mxu0 %v1656_v12  ;;  %1442 = vmatprep.mubr.msk.f32.mxu0 %vm1944_vm0, %v1945_v1  ;;  %v614_v12 = vand.u32 4294901760, %v575_v9 }
  0x57   :  { %1688 = vmatprep.subr.bf16.mxu0 %v1943_v0 }
  0x58   :  { %v2062_v15 = vsub.f32 %v575_v9, %v614_v12  ;;  %v2080_v29 = vpack.c.bf16 %v614_v12, %v611_v11  ;;  %v722_v9 = vand.u32 4294901760, %v2049_v6  ;;  %v730_v11 = vsub.f32 %v2051_v7, %v729_v52 }
  0x59   :  { %v751_v7 = vsub.f32 %v2071_v22, %v750_v25 }
  0x5a   :  { %1690 = vmatpush3.bf16.msra.mxu0 %v1659_v18  ;;  %v1752_v18 = vpack.c.bf16 %v2062_v15, %v2060_v14  ;;  %v723_v53 = vsub.f32 %v2049_v6, %v722_v9  ;;  %v731_v16 = vand.u32 4294901760, %v730_v11  ;;  %v743_v60 = vand.u32 4294901760, %v2062_v15 }
  0x5b   :  { %1691 = vmatprep.subr.bf16.mxu0 %v1943_v0  ;;  %v752_v28 = vand.u32 4294901760, %v751_v7  ;;  %v2165_v45 = vpack.c.bf16 %v729_v52, %v722_v9 }
  0x5c   :  { %1753 = vmatpush3.bf16.msra.mxu1 %v1752_v18  ;;  %v724_v12 = vand.u32 4294901760, %v723_v53 }
  0x5d   :  { %1443 = vmatmul.mubr.f32.vlgmr.msra.gmra.mrb[0].mxu0 %v116_v17  ;;  %v577_v17 = vld [vmem:[#allocation5 + $0x78] sm:$0xff]  ;;  %1754 = vmatprep.subr.bf16.mxu1 %v1943_v0 }
  0x5e   :  { %1477 = vmatprep.mubr.msk.f32.mxu0 %vm1944_vm0, %v1945_v1  ;;  %1693 = vmatpush3.bf16.msra.mxu0 %v2036_v59  ;;  %v620_v20 = vand.u32 4294901760, %v577_v17  ;;  %v2135_v18 = vpack.c.bf16 %v731_v16, %v724_v12 }
  0x5f   :  { %1694 = vmatprep.subr.bf16.mxu0 %v1943_v0 }
  0x60   :  { %v2073_v23 = vsub.f32 %v577_v17, %v620_v20  ;;  %v2090_v35 = vpack.c.bf16 %v620_v20, %v617_v19  ;;  %v736_v17 = vand.u32 4294901760, %v2060_v14  ;;  %v744_v19 = vsub.f32 %v2062_v15, %v743_v60 }
  0x61   :  { %v765_v15 = vsub.f32 %v2082_v30, %v764_v33  ;;  %v2161_v30 = vpack.c.bf16 %v701_v54, %v694_v51 }
  0x62   :  { %1696 = vmatpush3.bf16.msra.mxu0 %v2047_v5  ;;  %v1755_v26 = vpack.c.bf16 %v2073_v23, %v2071_v22  ;;  %v737_v61 = vsub.f32 %v2060_v14, %v736_v17  ;;  %v745_v24 = vand.u32 4294901760, %v744_v19  ;;  %v757_v6 = vand.u32 4294901760, %v2073_v23 }
  0x63   :  { %1697 = vmatprep.subr.bf16.mxu0 %v1943_v0  ;;  %v771_v14 = vand.u32 4294901760, %v2084_v31  ;;  %v766_v37 = vand.u32 4294901760, %v765_v15  ;;  %v785_v22 = vand.u32 4294901760, %v2095_v39  ;;  %v2167_v2 = vpack.c.bf16 %v743_v60, %v736_v17 }
  0x64   :  { %1756 = vmatpush3.bf16.msra.mxu1 %v1755_v26  ;;  %v738_v20 = vand.u32 4294901760, %v737_v61  ;;  %v758_v27 = vsub.f32 %v2073_v23, %v757_v6  ;;  %v779_v23 = vsub.f32 %v2093_v38, %v778_v47  ;;  %v2169_v3 = vpack.c.bf16 %v757_v6, %v750_v25  ;;  %v548_v6 = vld [vmem:[#allocation5 + $0xa0] sm:$0x1] }
  0x65   :  { %1757 = vmatprep.subr.bf16.mxu1 %v1943_v0  ;;  %v772_v36 = vsub.f32 %v2084_v31, %v771_v14  ;;  %v786_v49 = vsub.f32 %v2095_v39, %v785_v22  ;;  %v2163_v31 = vpack.c.bf16 %v715_v62, %v708_v46  ;;  %v2171_v4 = vpack.c.bf16 %v771_v14, %v764_v33  ;;  %v1245_v33 = vld [vmem:[#allocation5 + $0xa1] ss:$0 sm:$0xff] }
  0x66   :  { %1699 = vmatpush3.bf16.msra.mxu0 %v2058_v13  ;;  %v2141_v26 = vpack.c.bf16 %v745_v24, %v738_v20  ;;  %v759_v32 = vand.u32 4294901760, %v758_v27  ;;  %v780_v56 = vand.u32 4294901760, %v779_v23  ;;  %v2173_v38 = vpack.c.bf16 %v785_v22, %v778_v47 }
  0x67   :  { %1700 = vmatprep.subr.bf16.mxu0 %v1943_v0  ;;  %v787_v57 = vand.u32 4294901760, %v786_v49  ;;  %v554_v24 = vlaneseq }
  0x68   :  { %1759 = vmatpush3.bf16.msra.mxu1 %v1758_v34  ;;  %v2147_v34 = vpack.c.bf16 %v759_v32, %v752_v28 }
  0x69   :  { %1760 = vmatprep.subr.bf16.mxu1 %v1943_v0  ;;  %v2159_v58 = vpack.c.bf16 %v787_v57, %v780_v56  ;;  %v555_v25 = vshrl.u32 %v554_v24, 7 }
  0x6a   :  { %1702 = vmatpush3.bf16.msra.mxu0 %v2069_v21 }
  0x6b   :  { %1703 = vmatprep.subr.bf16.mxu0 %v1943_v0  ;;  %v556_v7 = vsub.s32 0, %v555_v25 }
  0x6c   :  { %1762 = vmatpush3.bf16.msra.mxu1 %v1761_v41  ;;  %v773_v41 = vand.u32 4294901760, %v772_v36 }
  0x6d   :  { %1763 = vmatprep.subr.bf16.mxu1 %v1943_v0 }
  0x6e   :  { %1705 = vmatpush3.bf16.msra.mxu0 %v2080_v29  ;;  %v2153_v48 = vpack.c.bf16 %v773_v41, %v766_v37 }
  0x6f   :  { %1706 = vmatprep.subr.bf16.mxu0 %v1943_v0 }
  0x72   :  { %1708 = vmatpush3.bf16.msra.mxu0 %v2090_v35 }
  0x73   :  { %1709 = vmatprep.subr.bf16.mxu0 %v1943_v0 }
  0x76   :  { %1711 = vmatpush3.bf16.msra.mxu0 %v2099_v40 }
  0x77   :  { %1712 = vmatprep.subr.bf16.mxu0 %v1943_v0 }
  0x7a   :  { %1714 = vmatpush3.bf16.msra.mxu0 %v2109_v44 }
  0x7b   :  { %1715 = vmatprep.subr.bf16.mxu0 %v1943_v0 }
 0x130   :  { %v528_v39 = vpop.f32.mrb[0].mxu0 }
 0x131   :  { %v532_v42 = vrot.slane %v528_v39, 4  ;;  %v1444_v43 = vpop.f32.mrb[1].mxu0 }
 0x133   :  { %v533_v8 = vadd.f32 %v532_v42, %v528_v39 }
 0x135   :  { %v534_v53 = vrot.slane %v533_v8, 2 }
 0x137   :  { %v535_v11 = vadd.f32 %v534_v53, %v533_v8 }
 0x139   :  { %v536_v51 = vrot.slane %v535_v11, 1 }
 0x13b   :  { %v537_v54 = vadd.f32 %v536_v51, %v535_v11 }
 0x13d   :  { %v538_v46 = vmul.f32 0.125, %v537_v54 }
 0x13f   :  { %v539_v62 = vsub.f32 %v528_v39, %v538_v46 }
 0x141   :  { %v540_v9 = vmul.f32 %v539_v62, %v539_v62 }
 0x143   :  { %v541_v52 = vrot.slane %v540_v9, 4 }
 0x145   :  { %v542_v12 = vadd.f32 %v541_v52, %v540_v9 }
 0x147   :  { %v543_v16 = vrot.slane %v542_v12, 2 }
 0x149   :  { %v544_v17 = vadd.f32 %v543_v16, %v542_v12 }
 0x14b   :  { %v545_v60 = vrot.slane %v544_v17, 1 }
 0x14d   :  { %v546_v61 = vadd.f32 %v545_v60, %v544_v17 }
 0x14f   :  { %v547_v19 = vmul.f32 0.125, %v546_v61 }
 0x151   :  { %v551_v20 = vadd.f32 1e-05, %v547_v19 }
 0x153   :  { %1863 = vrsqrt.f32 %v551_v20 }
 0x15d   :  { %v1864_v27 = vpop.eup %1863 }
 0x15e   :  { %v553_v28 = vmul.f32 %v1864_v27, %v548_v6 }
 0x160   :  { %v557_v32 = vrot.slane %v553_v28, %v556_v7 }
 0x162   :  { %v558_v14 = vmul.f32 %v557_v32, %v539_v62 }
 0x164   :  { %v563_v15 = vadd.f32 %v1245_v33, %v558_v14 }
 0x166   :  { %v564_v36 = vmul.f32 0.2, %v563_v15 }
 0x168   :  { %v565_v37 = vmax.f32 %v563_v15, %v564_v36 }
 0x16a   :  { %v2175_v41 = vand.u32 4294901760, %v565_v37 }
 0x16c   :  { %v668_v47 = vsub.f32 %v565_v37, %v2175_v41 }
 0x16e   :  { %v669_v22 = vand.u32 4294901760, %v668_v47  ;;  %1548 = vmatmul.mubr.f32.vlgmr.msra.gmra.mrb[0].mxu1 %v668_v47 }
 0x16f   :  { %1765 = vmatpush3.bf16.msra.mxu1 %v2036_v59  ;;  %1582 = vmatprep.mubr.msk.f32.mxu1 %vm1944_vm0, %v1945_v1 }
 0x170   :  { %1766 = vmatprep.subr.bf16.mxu1 %v1943_v0  ;;  %v670_v23 = vsub.f32 %v668_v47, %v669_v22 }
 0x172   :  { %v671_v49 = vand.u32 4294901760, %v670_v23 }
 0x173   :  { %1768 = vmatpush3.bf16.msra.mxu1 %v2047_v5 }
 0x174   :  { %1478 = vmatmul.mubr.f32.vlgmr.msra.gmra.mrb[2].mxu0 %v671_v49  ;;  %1769 = vmatprep.subr.bf16.mxu1 %v1943_v0 }
 0x175   :  { %1717 = vmatpush3.bf16.msra.mxu0 %v2117_v55  ;;  %1512 = vmatprep.mubr.msk.f32.mxu0 %vm1944_vm0, %v1945_v1 }
 0x176   :  { %1718 = vmatprep.subr.bf16.mxu0 %v1943_v0 }
 0x177   :  { %1771 = vmatpush3.bf16.msra.mxu1 %v2058_v13 }
 0x178   :  { %1772 = vmatprep.subr.bf16.mxu1 %v1943_v0 }
 0x179   :  { %1720 = vmatpush3.bf16.msra.mxu0 %v2123_v63 }
 0x17a   :  { %1721 = vmatprep.subr.bf16.mxu0 %v1943_v0 }
 0x17b   :  { %1774 = vmatpush3.bf16.msra.mxu1 %v2069_v21 }
 0x17c   :  { %1775 = vmatprep.subr.bf16.mxu1 %v1943_v0 }
 0x17d   :  { %1723 = vmatpush3.bf16.msra.mxu0 %v2129_v10 }
 0x17e   :  { %1724 = vmatprep.subr.bf16.mxu0 %v1943_v0 }
 0x17f   :  { %1777 = vmatpush3.bf16.msra.mxu1 %v2080_v29 }
 0x180   :  { %1778 = vmatprep.subr.bf16.mxu1 %v1943_v0 }
 0x181   :  { %1726 = vmatpush3.bf16.msra.mxu0 %v2135_v18 }
 0x182   :  { %1727 = vmatprep.subr.bf16.mxu0 %v1943_v0 }
 0x183   :  { %1780 = vmatpush3.bf16.msra.mxu1 %v2090_v35 }
 0x184   :  { %1781 = vmatprep.subr.bf16.mxu1 %v1943_v0 }
 0x185   :  { %1729 = vmatpush3.bf16.msra.mxu0 %v2141_v26 }
 0x186   :  { %1730 = vmatprep.subr.bf16.mxu0 %v1943_v0 }
 0x187   :  { %1783 = vmatpush3.bf16.msra.mxu1 %v2099_v40 }
 0x188   :  { %1784 = vmatprep.subr.bf16.mxu1 %v1943_v0 }
 0x189   :  { %1732 = vmatpush3.bf16.msra.mxu0 %v2147_v34 }
 0x18a   :  { %1733 = vmatprep.subr.bf16.mxu0 %v1943_v0 }
 0x18b   :  { %1786 = vmatpush3.bf16.msra.mxu1 %v2109_v44 }
 0x18c   :  { %1787 = vmatprep.subr.bf16.mxu1 %v1943_v0 }
 0x18d   :  { %1735 = vmatpush3.bf16.msra.mxu0 %v2153_v48 }
 0x18e   :  { %1583 = vmatmul.mubr.f32.vlgmr.msra.gmra.mrb[0].mxu1 %v669_v22  ;;  %1736 = vmatprep.subr.bf16.mxu0 %v1943_v0 }
 0x18f   :  { %1789 = vmatpush3.bf16.msra.mxu1 %v2157_v50  ;;  %1617 = vmatprep.mubr.msk.f32.mxu1 %vm1944_vm0, %v1945_v1 }
 0x190   :  { %1790 = vmatprep.subr.bf16.mxu1 %v1943_v0 }
 0x191   :  { %1738 = vmatpush3.bf16.msra.mxu0 %v2159_v58 }
 0x193   :  { %1792 = vmatpush3.bf16.msra.mxu1 %v2161_v30 }
 0x194   :  { %1513 = vmatmul.mubr.f32.vlgmr.msra.gmra.mrb[2].mxu0 %v2175_v41  ;;  %1793 = vmatprep.subr.bf16.mxu1 %v1943_v0 }
 0x197   :  { %1795 = vmatpush3.bf16.msra.mxu1 %v2163_v31 }
 0x198   :  { %1796 = vmatprep.subr.bf16.mxu1 %v1943_v0 }
 0x19b   :  { %1798 = vmatpush3.bf16.msra.mxu1 %v2165_v45 }
 0x19c   :  { %1799 = vmatprep.subr.bf16.mxu1 %v1943_v0 }
 0x19f   :  { %1801 = vmatpush3.bf16.msra.mxu1 %v2167_v2 }
 0x1a0   :  { %1802 = vmatprep.subr.bf16.mxu1 %v1943_v0 }
 0x1a3   :  { %1804 = vmatpush3.bf16.msra.mxu1 %v2169_v3 }
 0x1a4   :  { %1805 = vmatprep.subr.bf16.mxu1 %v1943_v0 }
 0x1a7   :  { %1807 = vmatpush3.bf16.msra.mxu1 %v2171_v4 }
 0x1a8   :  { %1808 = vmatprep.subr.bf16.mxu1 %v1943_v0 }
 0x1ab   :  { %1810 = vmatpush3.bf16.msra.mxu1 %v2173_v38 }
 0x1ac   :  { %1811 = vmatprep.subr.bf16.mxu1 %v1943_v0 }
 0x1ae   :  { %1618 = vmatmul.mubr.f32.vlgmr.msra.gmra.mrb[0].mxu1 %v2175_v41 }
 0x1af   :  { %1813 = vmatpush3.bf16.msra.mxu1 %v2036_v59  ;;  %1652 = vmatprep.mubr.msk.f32.mxu1 %vm1944_vm0, %v1945_v1 }
 0x1b0   :  { %1814 = vmatprep.subr.bf16.mxu1 %v1943_v0 }
 0x1b3   :  { %1816 = vmatpush3.bf16.msra.mxu1 %v2047_v5  ;;  %v1246_v5 = vld [vmem:[#allocation5 + $0xa2] ss:$0 sm:$0xff] }
 0x1b4   :  { %1817 = vmatprep.subr.bf16.mxu1 %v1943_v0 }
 0x1b7   :  { %1819 = vmatpush3.bf16.msra.mxu1 %v2058_v13 }
 0x1b8   :  { %1820 = vmatprep.subr.bf16.mxu1 %v1943_v0 }
 0x1bb   :  { %1822 = vmatpush3.bf16.msra.mxu1 %v2069_v21 }
 0x1bc   :  { %1823 = vmatprep.subr.bf16.mxu1 %v1943_v0 }
 0x1bf   :  { %1825 = vmatpush3.bf16.msra.mxu1 %v2080_v29 }
 0x1c0   :  { %1826 = vmatprep.subr.bf16.mxu1 %v1943_v0 }
 0x1c3   :  { %1828 = vmatpush3.bf16.msra.mxu1 %v2090_v35 }
 0x1c4   :  { %1829 = vmatprep.subr.bf16.mxu1 %v1943_v0 }
 0x1c7   :  { %1831 = vmatpush3.bf16.msra.mxu1 %v2099_v40 }
 0x1c8   :  { %1832 = vmatprep.subr.bf16.mxu1 %v1943_v0 }
 0x1cb   :  { %1834 = vmatpush3.bf16.msra.mxu1 %v2109_v44 }
 0x1ce   :  { %1653 = vmatmul.mubr.f32.vlgmr.msra.gmra.mrb[0].mxu1 %v2175_v41 }
 0x267   :  { %v824_v1 = vpop.f32.mrb[2].mxu0 }
 0x268   :  { %v1514_v59 = vpop.f32.mrb[3].mxu0  ;;  %v1835_v13 = vadd.f32 %v1246_v5, %v824_v1 }
 0x2a1   :  { %v1223_v21 = vpop.f32.mrb[0].mxu1 }
 0x2a2   :  { %v1836_v29 = vadd.f32 %v1835_v13, %v1223_v21  ;;  %v1654_v55 = vpop.f32.mrb[1].mxu1 }
 0x2a4   :  { %1865 = vtanh.f32 %v1836_v29 }
 0x2ae   :  { %v1866_v35 = vpop.eup %1865 }
 0x2af   :  { %1228 = vst [vmem:[#allocation7] sm:$0xff] %v1866_v35 }
 0x2b0   :  { %1922 = shalt.err (!%p1919_p6)
}
 0x2b1   :  { %s1923_s10 = scalar_lea.hbm %s2265_s2, 128 }
 0x2b2   :  { %p1924_p7 = scmp.ne.s32.totalorder %s2265_s2, %s1923_s10  ;;  %p1927_p8 = scmp.lt.u32.totalorder %s1923_s10, %s2265_s2 }
 0x2b4   :  { %p1929_p9 = pnand %p1927_p8, %p1924_p7 }
 0x2b6   :  { %1932 = shalt.err (!%p1929_p9)
}
 0x2b7   :  { %1238 = dma.vmem_to_hbm [thread:$0]  %s1236_s6, 128, %s2265_s2, [#allocation4]  }
 0x2b8   :  { %1937 = dma.done.wait [#allocation4], 128  }
 0x2b9   :  { %1938 = vsyncadd [#allocation4], 4294967168 }
 0x2ba   :  { %1242 = vsyncpa [#allocation3], 1 }
 0x2bb   :  { %1243 = vsyncpa [#allocation6], 1 }
 0x2bc   :  { %1244 = vsyncpa [#allocation4], 1 }

</bundles_post_ra>
